<compile_context>
chip_gen: v7x
topology: tpu7x:2x2x1
jax: 0.10.0
libtpu: 0.0.40
codegen_flags: <defaults>
</compile_context>

<pallas_src>
import functools

import jax
import jax.numpy as jnp
from jax.experimental import pallas as pl
from jax.experimental.pallas import tpu as pltpu


# --------------------------------------------------------------------------- #
# Kernel
# --------------------------------------------------------------------------- #
def t5_block_kernel(h_ref, mask_ref, pbias_ref,
                    ln1_ref, wq_ref, wk_ref, wv_ref, wo_ref,
                    ln2_ref, wi_ref, woff_ref,
                    out_ref, *, num_heads, d_head, q_tile, eps):
    f32, bf16 = jnp.float32, jnp.bfloat16
    H, dh, tq = num_heads, d_head, q_tile
    S = h_ref.shape[1]
    n_q = S // tq

    ln1 = ln1_ref[...]          # (1, D) f32
    ln2 = ln2_ref[...]          # (1, D) f32

    def rms(y, w):              # T5 LayerNorm: RMS only (no mean / bias), f32
        return y * jax.lax.rsqrt(jnp.mean(y * y, axis=-1, keepdims=True) + eps) * w

    # ---- K / V over the full sequence (shared by every query tile) ----
    x_all = h_ref[0].astype(f32)                                     # (S, D)
    xn_all = rms(x_all, ln1).astype(bf16)
    k = jnp.dot(xn_all, wk_ref[...], preferred_element_type=f32)     # (S, H*dh)
    v = jnp.dot(xn_all, wv_ref[...], preferred_element_type=f32)
    k3 = jnp.swapaxes(k.reshape(S, H, dh), 0, 1).astype(bf16)        # (H, S, dh)
    v3 = jnp.swapaxes(v.reshape(S, H, dh), 0, 1).astype(bf16)

    # ---- flash-style loop over query tiles: only (H, tq, S) slabs live ----
    @pl.loop(0, n_q)
    def _(t):
        q0 = pl.multiple_of(t * tq, tq)

        x_t = h_ref[0, pl.ds(q0, tq), :].astype(f32)                 # (tq, D)
        xn_t = rms(x_t, ln1).astype(bf16)
        q2 = jnp.dot(xn_t, wq_ref[...], preferred_element_type=f32)  # (tq, H*dh)
        q3 = jnp.swapaxes(q2.reshape(tq, H, dh), 0, 1).astype(bf16)  # (H, tq, dh)

        # T5: no 1/sqrt(dh) scaling.  Bias + key-padding mask added in the
        # scores expression (used once -> never materialized separately).
        # NOTE: mask is key-only (B,1,1,S); per-query mask structure would be
        # dropped by this broadcast.
        s = (jnp.einsum('hqd,hkd->hqk', q3, k3, preferred_element_type=f32)
             + pbias_ref[0, :, pl.ds(q0, tq), :].astype(f32)
             + mask_ref[0, 0])                                       # (H, tq, S)

        # softmax with deferred normalization (scale after PV; EUP reciprocal).
        e = jnp.exp(s - jnp.max(s, axis=-1, keepdims=True))          # (H, tq, S)
        denom = jnp.sum(e, axis=-1, keepdims=True)                   # (H, tq, 1)
        ctx = jnp.einsum('hqk,hkd->hqd', e.astype(bf16), v3,
                         preferred_element_type=f32)                 # (H, tq, dh)
        ctx = ctx * pl.reciprocal(denom, approx=True)

        ctx2 = jnp.swapaxes(ctx, 0, 1).reshape(tq, H * dh).astype(bf16)
        attn = jnp.dot(ctx2, wo_ref[...], preferred_element_type=f32)  # (tq, D)
        h1 = x_t + attn                                              # residual f32

        # ---- feed-forward sublayer on the same row tile ----
        h1n = rms(h1, ln2).astype(bf16)
        ff = jnp.dot(h1n, wi_ref[...], preferred_element_type=f32)   # (tq, d_ff)
        ff = jnp.maximum(ff, 0.0).astype(bf16)                       # ReLU
        ff = jnp.dot(ff, woff_ref[...], preferred_element_type=f32)  # (tq, D)

        out_ref[0, pl.ds(q0, tq), :] = (h1 + ff).astype(out_ref.dtype)


# --------------------------------------------------------------------------- #
# Helpers
# --------------------------------------------------------------------------- #
def _pick_q_tile(seq_len):
    # >=128 rows per MXU call at production shapes; full-S for tiny sequences.
    for t in (256, 128, 64, 32, 16, 8):
        if seq_len % t == 0:
            return t
    return seq_len


def _vmem_limit_bytes(S, D, H, dh, d_ff, tq):
    """Generation-aware VMEM budget (operand buffers + live intermediates)."""
    f32, b16 = 4, 2
    inner = H * dh
    # per-grid-step pipelined operands (double-buffered): hidden in/out + mask
    streamed = 2 * (2 * S * D * b16 + S * f32)
    # grid-invariant operands; budgeted double-buffered so the no-Buffered(1)
    # fallback also fits
    consts = 2 * (H * S * S * b16 + 2 * D * f32
                  + (3 * D * inner + inner * D + 2 * D * d_ff) * b16)
    # live in-kernel intermediates: full-S K/V + one query tile's slabs
    live = (2 * H * S * dh * b16 + S * D * b16
            + 2 * H * tq * S * f32
            + (H * tq * dh + 4 * tq * D + tq * d_ff) * f32)
    budget = int(1.5 * (streamed + consts + live)) + (4 << 20)
    try:
        cap = int(0.85 * pltpu.get_tpu_info().vmem_capacity_bytes)
    except Exception:                      # no info available: safe on all gens
        cap = 64 << 20
    return max(16 << 20, min(budget, cap))


_BUFFERED1_OK = None


def _single_buffered_consts_supported():
    """One-time, lowering/compile-only probe (no kernel execution): does this
    jax / Mosaic accept pipeline_mode=pl.Buffered(1) on a top-level BlockSpec?"""
    global _BUFFERED1_OK
    if _BUFFERED1_OK is not None:
        return _BUFFERED1_OK

    def _probe(x_ref, o_ref):
        o_ref[...] = x_ref[...] * 2.0

    try:
        fn = pl.pallas_call(
            _probe,
            out_shape=jax.ShapeDtypeStruct((8, 128), jnp.float32),
            grid=(2,),
            in_specs=[pl.BlockSpec((8, 128), lambda i: (0, 0),
                                   pipeline_mode=pl.Buffered(1))],
            out_specs=pl.BlockSpec((8, 128), lambda i: (0, 0)),
        )
        jax.jit(fn).lower(jnp.zeros((8, 128), jnp.float32)).compile()
        _BUFFERED1_OK = True
    except Exception:
        _BUFFERED1_OK = False
    return _BUFFERED1_OK


# --------------------------------------------------------------------------- #
# Wrapper (CheckpointWrapper.forward at inference == module(...) pass-through)
# --------------------------------------------------------------------------- #
def checkpoint_wrapper_forward(hidden_states, attention_mask, position_bias, params):
    bf16, f32 = jnp.bfloat16, jnp.float32
    B, S, D = hidden_states.shape
    H, dh = params["num_heads"], params["d_head"]
    inner = H * dh
    d_ff = params["wi"].shape[1]
    tq = _pick_q_tile(S)

    kernel = functools.partial(t5_block_kernel, num_heads=H, d_head=dh,
                               q_tile=tq, eps=1e-6)

    # Hidden states cross the kernel boundary in bf16; weights already bf16.
    args = (hidden_states.astype(bf16),
            attention_mask.astype(f32),
            position_bias.astype(bf16),
            params["ln1"], params["wq"], params["wk"], params["wv"],
            params["wo"], params["ln2"], params["wi"], params["wo_ff"])

    flops = 2 * B * S * (3 * D * inner + 2 * S * inner + inner * D + 2 * D * d_ff)
    cost = pl.CostEstimate(
        flops=int(flops),
        transcendentals=int(B * H * S * S + 4 * B * S),
        bytes_accessed=int(sum(a.size * a.dtype.itemsize for a in args)
                           + B * S * D * 2))

    single = _single_buffered_consts_supported()

    def const_spec(shape):
        idx = lambda b: (0,) * len(shape)
        if single:
            return pl.BlockSpec(shape, idx, pipeline_mode=pl.Buffered(1))
        return pl.BlockSpec(shape, idx)

    call = pl.pallas_call(
        kernel,
        out_shape=jax.ShapeDtypeStruct((B, S, D), bf16),
        grid_spec=pltpu.PrefetchScalarGridSpec(
            num_scalar_prefetch=0,
            # B = batch * n_passages.  Keep it >= 2 (ideally even) so both
            # v7x TensorCores get work under dimension_semantics="parallel".
            grid=(B,),
            in_specs=[
                pl.BlockSpec((1, S, D), lambda b: (b, 0, 0)),        # hidden (bf16)
                pl.BlockSpec((1, 1, 1, S), lambda b: (b, 0, 0, 0)),  # additive mask
                const_spec((1, H, S, S)),                            # position bias
                const_spec((1, D)),                                  # ln1
                const_spec((D, inner)),                              # Wq
                const_spec((D, inner)),                              # Wk
                const_spec((D, inner)),                              # Wv
                const_spec((inner, D)),                              # Wo
                const_spec((1, D)),                                  # ln2
                const_spec((D, d_ff)),                               # wi
                const_spec((d_ff, D)),                               # wo_ff
            ],
            out_specs=pl.BlockSpec((1, S, D), lambda b: (b, 0, 0)),
        ),
        compiler_params=pltpu.CompilerParams(
            dimension_semantics=("parallel",),
            vmem_limit_bytes=_vmem_limit_bytes(S, D, H, dh, d_ff, tq)),
        cost_estimate=cost,
    )
    hidden_out = call(*args)

    # The wrapped T5 block returns a tuple; the wrapper passes it through.
    return (hidden_out, position_bias)


def make_params(key, D, H, dh, d_ff):
    """T5 block params.  Projection / FFN weights stored once in bf16 (MXU
    inputs); RMSNorm scales in f32 -- no per-call casts in the wrapper."""
    ks = jax.random.split(key, 6)
    scale = 0.02
    inner = H * dh
    bf16 = jnp.bfloat16
    return {
        "num_heads": H, "d_head": dh,
        "ln1": jnp.ones((1, D), jnp.float32),
        "ln2": jnp.ones((1, D), jnp.float32),
        "wq": (scale * jax.random.normal(ks[0], (D, inner), jnp.float32)).astype(bf16),
        "wk": (scale * jax.random.normal(ks[1], (D, inner), jnp.float32)).astype(bf16),
        "wv": (scale * jax.random.normal(ks[2], (D, inner), jnp.float32)).astype(bf16),
        "wo": (scale * jax.random.normal(ks[3], (inner, D), jnp.float32)).astype(bf16),
        "wi": (scale * jax.random.normal(ks[4], (D, d_ff), jnp.float32)).astype(bf16),
        "wo_ff": (scale * jax.random.normal(ks[5], (d_ff, D), jnp.float32)).astype(bf16),
    }


def t5_block_reference(h, mask, pbias, params, eps=1e-6):
    """Pure-JAX f32 reference of the wrapped T5 block (for validation)."""
    x = h.astype(jnp.float32)
    B, S, D = x.shape
    H, dh = params["num_heads"], params["d_head"]
    wq = params["wq"].astype(jnp.float32)
    wk = params["wk"].astype(jnp.float32)
    wv = params["wv"].astype(jnp.float32)
    wo = params["wo"].astype(jnp.float32)
    wi = params["wi"].astype(jnp.float32)
    wo_ff = params["wo_ff"].astype(jnp.float32)

    def rms(y, w):
        return y * jax.lax.rsqrt(jnp.mean(y * y, -1, keepdims=True) + eps) * w

    xn = rms(x, params["ln1"])
    q = (xn @ wq).reshape(B, S, H, dh).transpose(0, 2, 1, 3)
    k = (xn @ wk).reshape(B, S, H, dh).transpose(0, 2, 1, 3)
    v = (xn @ wv).reshape(B, S, H, dh).transpose(0, 2, 1, 3)
    scores = jnp.einsum('bhqd,bhkd->bhqk', q, k) + pbias + mask
    p = jax.nn.softmax(scores, axis=-1)
    ctx = jnp.einsum('bhqk,bhkd->bhqd', p, v).transpose(0, 2, 1, 3).reshape(B, S, H * dh)
    h1 = x + ctx @ wo
    h1n = rms(h1, params["ln2"])
    return h1 + jnp.maximum(h1n @ wi, 0.0) @ wo_ff


if __name__ == "__main__":
    B, S, D, H, dh, d_ff = 2, 8, 32, 2, 16, 64
    key = jax.random.PRNGKey(0)
    k_h, k_b, k_p = jax.random.split(key, 3)

    # hidden states enter the kernel in bf16 (as the surrounding FiD encoder
    # stack would provide them)
    hidden_states = jax.random.normal(k_h, (B, S, D), jnp.float32).astype(jnp.bfloat16)

    # padding mask -> additive mask (0 keep, -1e9 masked); mask last 2 keys of batch 1
    pad = jnp.ones((B, S), jnp.float32).at[1, -2:].set(0.0)
    attention_mask = ((1.0 - pad) * -1e9)[:, None, None, :]          # (B,1,1,S)

    position_bias = 0.1 * jax.random.normal(k_b, (1, H, S, S), jnp.float32)

    params = make_params(k_p, D, H, dh, d_ff)

    out_hidden, out_bias = checkpoint_wrapper_forward(
        hidden_states, attention_mask, position_bias, params)
    out_hidden = jax.block_until_ready(out_hidden)

    ref = t5_block_reference(hidden_states.astype(jnp.float32),
                             attention_mask, position_bias, params)
    err = float(jnp.max(jnp.abs(out_hidden.astype(jnp.float32) - ref)))
    assert err == err, "NaN in kernel output"
    assert err < 1e-1, f"max abs error vs reference: {err}"  # bf16 I/O tolerance
    assert out_bias.shape == position_bias.shape

    print("KERNEL_OK")
</pallas_src>

<mosaic_0001>
module attributes {stable_mosaic.version = 11 : i64} {
  func.func @t5_block_kernel(%arg0: i32, %arg1: memref<1x8x32xbf16, #tpu.memory_space<vmem>>, %arg2: memref<1x1x1x8xf32, #tpu.memory_space<vmem>>, %arg3: memref<1x2x8x8xbf16, #tpu.memory_space<vmem>>, %arg4: memref<1x32xf32, #tpu.memory_space<vmem>>, %arg5: memref<32x32xbf16, #tpu.memory_space<vmem>>, %arg6: memref<32x32xbf16, #tpu.memory_space<vmem>>, %arg7: memref<32x32xbf16, #tpu.memory_space<vmem>>, %arg8: memref<32x32xbf16, #tpu.memory_space<vmem>>, %arg9: memref<1x32xf32, #tpu.memory_space<vmem>>, %arg10: memref<32x64xbf16, #tpu.memory_space<vmem>>, %arg11: memref<64x32xbf16, #tpu.memory_space<vmem>>, %arg12: memref<1x8x32xbf16, #tpu.memory_space<vmem>>) attributes {dimension_semantics = [#tpu.dimension_semantics<parallel>], iteration_bounds = array<i64: 2>, scalar_prefetch = 0 : i64, scratch_operands = 0 : i64, tpu.core_type = #tpu.core_type<tc>, window_params = [{transform_indices = @transform_0, window_bounds = array<i64: 1, 8, 32>}, {transform_indices = @transform_1, window_bounds = array<i64: 1, 1, 1, 8>}, {pipeline_mode = #tpu.pipeline_mode<synchronous>, transform_indices = @transform_2, window_bounds = array<i64: 1, 2, 8, 8>}, {pipeline_mode = #tpu.pipeline_mode<synchronous>, transform_indices = @transform_3, window_bounds = array<i64: 1, 32>}, {pipeline_mode = #tpu.pipeline_mode<synchronous>, transform_indices = @transform_4, window_bounds = array<i64: 32, 32>}, {pipeline_mode = #tpu.pipeline_mode<synchronous>, transform_indices = @transform_5, window_bounds = array<i64: 32, 32>}, {pipeline_mode = #tpu.pipeline_mode<synchronous>, transform_indices = @transform_6, window_bounds = array<i64: 32, 32>}, {pipeline_mode = #tpu.pipeline_mode<synchronous>, transform_indices = @transform_7, window_bounds = array<i64: 32, 32>}, {pipeline_mode = #tpu.pipeline_mode<synchronous>, transform_indices = @transform_8, window_bounds = array<i64: 1, 32>}, {pipeline_mode = #tpu.pipeline_mode<synchronous>, transform_indices = @transform_9, window_bounds = array<i64: 32, 64>}, {pipeline_mode = #tpu.pipeline_mode<synchronous>, transform_indices = @transform_10, window_bounds = array<i64: 64, 32>}, {transform_indices = @transform_11, window_bounds = array<i64: 1, 8, 32>}]} {
    %c0 = arith.constant 0 : index
    %c0_0 = arith.constant 0 : index
    %0 = vector.load %arg4[%c0, %c0_0] : memref<1x32xf32, #tpu.memory_space<vmem>>, vector<1x32xf32>
    %c0_1 = arith.constant 0 : index
    %c0_2 = arith.constant 0 : index
    %1 = vector.load %arg9[%c0_1, %c0_2] : memref<1x32xf32, #tpu.memory_space<vmem>>, vector<1x32xf32>
    %c0_3 = arith.constant 0 : index
    %c0_4 = arith.constant 0 : index
    %c0_5 = arith.constant 0 : index
    %2 = vector.load %arg1[%c0_3, %c0_4, %c0_5] : memref<1x8x32xbf16, #tpu.memory_space<vmem>>, vector<1x8x32xbf16>
    %3 = vector.shape_cast %2 : vector<1x8x32xbf16> to vector<8x32xbf16>
    %4 = arith.extf %3 : vector<8x32xbf16> to vector<8x32xf32>
    %5 = arith.mulf %4, %4 : vector<8x32xf32>
    %cst = arith.constant dense<0.000000e+00> : vector<8xf32>
    %6 = vector.multi_reduction <add>, %5, %cst [1] : vector<8x32xf32> to vector<8xf32>
    %7 = vector.shape_cast %6 : vector<8xf32> to vector<8x1xf32>
    %cst_6 = arith.constant 3.200000e+01 : f32
    %8 = vector.broadcast %cst_6 : f32 to vector<8x1xf32>
    %9 = arith.divf %7, %8 : vector<8x1xf32>
    %cst_7 = arith.constant 9.99999997E-7 : f32
    %10 = vector.broadcast %cst_7 : f32 to vector<8x1xf32>
    %11 = arith.addf %9, %10 : vector<8x1xf32>
    %12 = math.rsqrt %11 : vector<8x1xf32>
    %13 = vector.broadcast %12 : vector<8x1xf32> to vector<8x32xf32>
    %14 = arith.mulf %4, %13 : vector<8x32xf32>
    %15 = vector.broadcast %0 : vector<1x32xf32> to vector<8x32xf32>
    %16 = arith.mulf %14, %15 : vector<8x32xf32>
    %17 = arith.truncf %16 : vector<8x32xf32> to vector<8x32xbf16>
    %c0_8 = arith.constant 0 : index
    %c0_9 = arith.constant 0 : index
    %18 = vector.load %arg6[%c0_8, %c0_9] : memref<32x32xbf16, #tpu.memory_space<vmem>>, vector<32x32xbf16>
    %cst_10 = arith.constant dense<0.000000e+00> : vector<8x32xf32>
    %19 = tpu.matmul %17, %18, %cst_10 {dimension_numbers = #tpu.dot_dimension_numbers<[1], [0], [0], [1], [0, 0, 1, 1], [], []>} : vector<8x32xbf16>, vector<32x32xbf16>, vector<8x32xf32> -> vector<8x32xf32>
    %c0_11 = arith.constant 0 : index
    %c0_12 = arith.constant 0 : index
    %20 = vector.load %arg7[%c0_11, %c0_12] : memref<32x32xbf16, #tpu.memory_space<vmem>>, vector<32x32xbf16>
    %cst_13 = arith.constant dense<0.000000e+00> : vector<8x32xf32>
    %21 = tpu.matmul %17, %20, %cst_13 {dimension_numbers = #tpu.dot_dimension_numbers<[1], [0], [0], [1], [0, 0, 1, 1], [], []>} : vector<8x32xbf16>, vector<32x32xbf16>, vector<8x32xf32> -> vector<8x32xf32>
    %22 = vector.shape_cast %19 : vector<8x32xf32> to vector<8x2x16xf32>
    %23 = tpu.transpose %22, [1, 0, 2] : vector<8x2x16xf32> -> vector<2x8x16xf32>
    %24 = arith.truncf %23 : vector<2x8x16xf32> to vector<2x8x16xbf16>
    %25 = vector.shape_cast %21 : vector<8x32xf32> to vector<8x2x16xf32>
    %26 = tpu.transpose %25, [1, 0, 2] : vector<8x2x16xf32> -> vector<2x8x16xf32>
    %27 = arith.truncf %26 : vector<2x8x16xf32> to vector<2x8x16xbf16>
    %c0_i32 = arith.constant 0 : i32
    %c1_i32 = arith.constant 1 : i32
    %28 = arith.muli %c0_i32, %c1_i32 : i32
    %c0_i32_14 = arith.constant 0 : i32
    %29 = arith.addi %c0_i32_14, %28 : i32
    %c8_i32 = arith.constant 8 : i32
    %30 = arith.muli %29, %c8_i32 : i32
    %31 = tpu.assume_multiple %30, 8 : i32
    %c0_15 = arith.constant 0 : index
    %32 = arith.index_cast %31 : i32 to index
    %c0_16 = arith.constant 0 : index
    %33 = vector.load %arg1[%c0_15, %32, %c0_16] : memref<1x8x32xbf16, #tpu.memory_space<vmem>>, vector<1x8x32xbf16>
    %34 = vector.shape_cast %33 : vector<1x8x32xbf16> to vector<8x32xbf16>
    %35 = arith.extf %34 : vector<8x32xbf16> to vector<8x32xf32>
    %36 = arith.mulf %35, %35 : vector<8x32xf32>
    %cst_17 = arith.constant dense<0.000000e+00> : vector<8xf32>
    %37 = vector.multi_reduction <add>, %36, %cst_17 [1] : vector<8x32xf32> to vector<8xf32>
    %38 = vector.shape_cast %37 : vector<8xf32> to vector<8x1xf32>
    %cst_18 = arith.constant 3.200000e+01 : f32
    %39 = vector.broadcast %cst_18 : f32 to vector<8x1xf32>
    %40 = arith.divf %38, %39 : vector<8x1xf32>
    %cst_19 = arith.constant 9.99999997E-7 : f32
    %41 = vector.broadcast %cst_19 : f32 to vector<8x1xf32>
    %42 = arith.addf %40, %41 : vector<8x1xf32>
    %43 = math.rsqrt %42 : vector<8x1xf32>
    %44 = vector.broadcast %43 : vector<8x1xf32> to vector<8x32xf32>
    %45 = arith.mulf %35, %44 : vector<8x32xf32>
    %46 = vector.broadcast %0 : vector<1x32xf32> to vector<8x32xf32>
    %47 = arith.mulf %45, %46 : vector<8x32xf32>
    %48 = arith.truncf %47 : vector<8x32xf32> to vector<8x32xbf16>
    %c0_20 = arith.constant 0 : index
    %c0_21 = arith.constant 0 : index
    %49 = vector.load %arg5[%c0_20, %c0_21] : memref<32x32xbf16, #tpu.memory_space<vmem>>, vector<32x32xbf16>
    %cst_22 = arith.constant dense<0.000000e+00> : vector<8x32xf32>
    %50 = tpu.matmul %48, %49, %cst_22 {dimension_numbers = #tpu.dot_dimension_numbers<[1], [0], [0], [1], [0, 0, 1, 1], [], []>} : vector<8x32xbf16>, vector<32x32xbf16>, vector<8x32xf32> -> vector<8x32xf32>
    %51 = vector.shape_cast %50 : vector<8x32xf32> to vector<8x2x16xf32>
    %52 = tpu.transpose %51, [1, 0, 2] : vector<8x2x16xf32> -> vector<2x8x16xf32>
    %53 = arith.truncf %52 : vector<2x8x16xf32> to vector<2x8x16xbf16>
    "tpu.trace_start"() <{level = 10 : i32, message = "hqd,hkd->hqk"}> : () -> ()
    %cst_23 = arith.constant dense<0.000000e+00> : vector<2x8x8xf32>
    %54 = tpu.matmul %53, %24, %cst_23 {dimension_numbers = #tpu.dot_dimension_numbers<[2], [2], [1], [1], [0, 0, 0, 1, 1, 1], [0], [0]>} : vector<2x8x16xbf16>, vector<2x8x16xbf16>, vector<2x8x8xf32> -> vector<2x8x8xf32>
    "tpu.trace_stop"() : () -> ()
    %c0_24 = arith.constant 0 : index
    %c0_25 = arith.constant 0 : index
    %55 = arith.index_cast %31 : i32 to index
    %c0_26 = arith.constant 0 : index
    %56 = vector.load %arg3[%c0_24, %c0_25, %55, %c0_26] : memref<1x2x8x8xbf16, #tpu.memory_space<vmem>>, vector<1x2x8x8xbf16>
    %57 = vector.shape_cast %56 : vector<1x2x8x8xbf16> to vector<2x8x8xbf16>
    %58 = arith.extf %57 : vector<2x8x8xbf16> to vector<2x8x8xf32>
    %59 = arith.addf %54, %58 : vector<2x8x8xf32>
    %c0_27 = arith.constant 0 : index
    %c0_28 = arith.constant 0 : index
    %c0_29 = arith.constant 0 : index
    %c0_30 = arith.constant 0 : index
    %60 = vector.load %arg2[%c0_27, %c0_28, %c0_29, %c0_30] : memref<1x1x1x8xf32, #tpu.memory_space<vmem>>, vector<1x1x1x8xf32>
    %61 = vector.shape_cast %60 : vector<1x1x1x8xf32> to vector<1x8xf32>
    %62 = vector.shape_cast %61 : vector<1x8xf32> to vector<1x1x8xf32>
    %63 = vector.broadcast %62 : vector<1x1x8xf32> to vector<2x8x8xf32>
    %64 = arith.addf %59, %63 : vector<2x8x8xf32>
    %cst_31 = arith.constant dense<0xFF800000> : vector<2x8xf32>
    %65 = vector.multi_reduction <maximumf>, %64, %cst_31 [2] : vector<2x8x8xf32> to vector<2x8xf32>
    %66 = vector.shape_cast %65 : vector<2x8xf32> to vector<2x8x1xf32>
    %67 = vector.broadcast %66 : vector<2x8x1xf32> to vector<2x8x8xf32>
    %68 = arith.subf %64, %67 : vector<2x8x8xf32>
    %69 = math.exp %68 : vector<2x8x8xf32>
    %cst_32 = arith.constant dense<0.000000e+00> : vector<2x8xf32>
    %70 = vector.multi_reduction <add>, %69, %cst_32 [2] : vector<2x8x8xf32> to vector<2x8xf32>
    %71 = vector.shape_cast %70 : vector<2x8xf32> to vector<2x8x1xf32>
    %72 = arith.truncf %69 : vector<2x8x8xf32> to vector<2x8x8xbf16>
    "tpu.trace_start"() <{level = 10 : i32, message = "hqk,hkd->hqd"}> : () -> ()
    %cst_33 = arith.constant dense<0.000000e+00> : vector<2x8x16xf32>
    %73 = tpu.matmul %72, %27, %cst_33 {dimension_numbers = #tpu.dot_dimension_numbers<[2], [1], [1], [2], [0, 0, 0, 1, 1, 2], [0], [0]>} : vector<2x8x8xbf16>, vector<2x8x16xbf16>, vector<2x8x16xf32> -> vector<2x8x16xf32>
    "tpu.trace_stop"() : () -> ()
    %74 = tpu.reciprocal %71 {approx = true} : vector<2x8x1xf32> -> vector<2x8x1xf32>
    %75 = vector.broadcast %74 : vector<2x8x1xf32> to vector<2x8x16xf32>
    %76 = arith.mulf %73, %75 : vector<2x8x16xf32>
    %77 = tpu.transpose %76, [1, 0, 2] : vector<2x8x16xf32> -> vector<8x2x16xf32>
    %78 = vector.shape_cast %77 : vector<8x2x16xf32> to vector<8x32xf32>
    %79 = arith.truncf %78 : vector<8x32xf32> to vector<8x32xbf16>
    %c0_34 = arith.constant 0 : index
    %c0_35 = arith.constant 0 : index
    %80 = vector.load %arg8[%c0_34, %c0_35] : memref<32x32xbf16, #tpu.memory_space<vmem>>, vector<32x32xbf16>
    %cst_36 = arith.constant dense<0.000000e+00> : vector<8x32xf32>
    %81 = tpu.matmul %79, %80, %cst_36 {dimension_numbers = #tpu.dot_dimension_numbers<[1], [0], [0], [1], [0, 0, 1, 1], [], []>} : vector<8x32xbf16>, vector<32x32xbf16>, vector<8x32xf32> -> vector<8x32xf32>
    %82 = arith.addf %35, %81 : vector<8x32xf32>
    %83 = arith.mulf %82, %82 : vector<8x32xf32>
    %cst_37 = arith.constant dense<0.000000e+00> : vector<8xf32>
    %84 = vector.multi_reduction <add>, %83, %cst_37 [1] : vector<8x32xf32> to vector<8xf32>
    %85 = vector.shape_cast %84 : vector<8xf32> to vector<8x1xf32>
    %cst_38 = arith.constant 3.200000e+01 : f32
    %86 = vector.broadcast %cst_38 : f32 to vector<8x1xf32>
    %87 = arith.divf %85, %86 : vector<8x1xf32>
    %cst_39 = arith.constant 9.99999997E-7 : f32
    %88 = vector.broadcast %cst_39 : f32 to vector<8x1xf32>
    %89 = arith.addf %87, %88 : vector<8x1xf32>
    %90 = math.rsqrt %89 : vector<8x1xf32>
    %91 = vector.broadcast %90 : vector<8x1xf32> to vector<8x32xf32>
    %92 = arith.mulf %82, %91 : vector<8x32xf32>
    %93 = vector.broadcast %1 : vector<1x32xf32> to vector<8x32xf32>
    %94 = arith.mulf %92, %93 : vector<8x32xf32>
    %95 = arith.truncf %94 : vector<8x32xf32> to vector<8x32xbf16>
    %c0_40 = arith.constant 0 : index
    %c0_41 = arith.constant 0 : index
    %96 = vector.load %arg10[%c0_40, %c0_41] : memref<32x64xbf16, #tpu.memory_space<vmem>>, vector<32x64xbf16>
    %cst_42 = arith.constant dense<0.000000e+00> : vector<8x64xf32>
    %97 = tpu.matmul %95, %96, %cst_42 {dimension_numbers = #tpu.dot_dimension_numbers<[1], [0], [0], [1], [0, 0, 1, 1], [], []>} : vector<8x32xbf16>, vector<32x64xbf16>, vector<8x64xf32> -> vector<8x64xf32>
    %cst_43 = arith.constant 0.000000e+00 : f32
    %98 = vector.broadcast %cst_43 : f32 to vector<8x64xf32>
    %99 = arith.maximumf %97, %98 : vector<8x64xf32>
    %100 = arith.truncf %99 : vector<8x64xf32> to vector<8x64xbf16>
    %c0_44 = arith.constant 0 : index
    %c0_45 = arith.constant 0 : index
    %101 = vector.load %arg11[%c0_44, %c0_45] : memref<64x32xbf16, #tpu.memory_space<vmem>>, vector<64x32xbf16>
    %cst_46 = arith.constant dense<0.000000e+00> : vector<8x32xf32>
    %102 = tpu.matmul %100, %101, %cst_46 {dimension_numbers = #tpu.dot_dimension_numbers<[1], [0], [0], [1], [0, 0, 1, 1], [], []>} : vector<8x64xbf16>, vector<64x32xbf16>, vector<8x32xf32> -> vector<8x32xf32>
    %103 = arith.addf %82, %102 : vector<8x32xf32>
    %104 = arith.truncf %103 : vector<8x32xf32> to vector<8x32xbf16>
    %c0_47 = arith.constant 0 : index
    %105 = arith.index_cast %31 : i32 to index
    %c0_48 = arith.constant 0 : index
    %106 = vector.load %arg12[%c0_47, %105, %c0_48] : memref<1x8x32xbf16, #tpu.memory_space<vmem>>, vector<1x8x32xbf16>
    %107 = vector.shape_cast %106 : vector<1x8x32xbf16> to vector<8x32xbf16>
    %108 = vector.shape_cast %104 : vector<8x32xbf16> to vector<1x8x32xbf16>
    tpu.vector_store %arg12[%c0_47, %105, %c0_48], %108 {strides = array<i32>} : memref<1x8x32xbf16, #tpu.memory_space<vmem>>, vector<1x8x32xbf16>,
    %c1_i32_49 = arith.constant 1 : i32
    return
  }
  func.func @transform_0(%arg0: i32) -> (i32, i32, i32) {
    %c0_i32 = arith.constant 0 : i32
    %c0_i32_0 = arith.constant 0 : i32
    %c0_i32_1 = arith.constant 0 : i32
    return %arg0, %c0_i32, %c0_i32_0 : i32, i32, i32
  }
  func.func @transform_1(%arg0: i32) -> (i32, i32, i32, i32) {
    %c0_i32 = arith.constant 0 : i32
    %c0_i32_0 = arith.constant 0 : i32
    %c0_i32_1 = arith.constant 0 : i32
    %c0_i32_2 = arith.constant 0 : i32
    return %arg0, %c0_i32, %c0_i32_0, %c0_i32_1 : i32, i32, i32, i32
  }
  func.func @transform_2(%arg0: i32) -> (i32, i32, i32, i32) {
    %c0_i32 = arith.constant 0 : i32
    %c0_i32_0 = arith.constant 0 : i32
    %c0_i32_1 = arith.constant 0 : i32
    %c0_i32_2 = arith.constant 0 : i32
    %c0_i32_3 = arith.constant 0 : i32
    return %c0_i32, %c0_i32_0, %c0_i32_1, %c0_i32_2 : i32, i32, i32, i32
  }
  func.func @transform_3(%arg0: i32) -> (i32, i32) {
    %c0_i32 = arith.constant 0 : i32
    %c0_i32_0 = arith.constant 0 : i32
    %c0_i32_1 = arith.constant 0 : i32
    return %c0_i32, %c0_i32_0 : i32, i32
  }
  func.func @transform_4(%arg0: i32) -> (i32, i32) {
    %c0_i32 = arith.constant 0 : i32
    %c0_i32_0 = arith.constant 0 : i32
    %c0_i32_1 = arith.constant 0 : i32
    return %c0_i32, %c0_i32_0 : i32, i32
  }
  func.func @transform_5(%arg0: i32) -> (i32, i32) {
    %c0_i32 = arith.constant 0 : i32
    %c0_i32_0 = arith.constant 0 : i32
    %c0_i32_1 = arith.constant 0 : i32
    return %c0_i32, %c0_i32_0 : i32, i32
  }
  func.func @transform_6(%arg0: i32) -> (i32, i32) {
    %c0_i32 = arith.constant 0 : i32
    %c0_i32_0 = arith.constant 0 : i32
    %c0_i32_1 = arith.constant 0 : i32
    return %c0_i32, %c0_i32_0 : i32, i32
  }
  func.func @transform_7(%arg0: i32) -> (i32, i32) {
    %c0_i32 = arith.constant 0 : i32
    %c0_i32_0 = arith.constant 0 : i32
    %c0_i32_1 = arith.constant 0 : i32
    return %c0_i32, %c0_i32_0 : i32, i32
  }
  func.func @transform_8(%arg0: i32) -> (i32, i32) {
    %c0_i32 = arith.constant 0 : i32
    %c0_i32_0 = arith.constant 0 : i32
    %c0_i32_1 = arith.constant 0 : i32
    return %c0_i32, %c0_i32_0 : i32, i32
  }
  func.func @transform_9(%arg0: i32) -> (i32, i32) {
    %c0_i32 = arith.constant 0 : i32
    %c0_i32_0 = arith.constant 0 : i32
    %c0_i32_1 = arith.constant 0 : i32
    return %c0_i32, %c0_i32_0 : i32, i32
  }
  func.func @transform_10(%arg0: i32) -> (i32, i32) {
    %c0_i32 = arith.constant 0 : i32
    %c0_i32_0 = arith.constant 0 : i32
    %c0_i32_1 = arith.constant 0 : i32
    return %c0_i32, %c0_i32_0 : i32, i32
  }
  func.func @transform_11(%arg0: i32) -> (i32, i32, i32) {
    %c0_i32 = arith.constant 0 : i32
    %c0_i32_0 = arith.constant 0 : i32
    %c0_i32_1 = arith.constant 0 : i32
    return %arg0, %c0_i32, %c0_i32_0 : i32, i32, i32
  }
}

</mosaic_0001>

<bundles_post_ra>
// kernel: tpu_custom_call.1
= control target key start
LH: loop header
LB: loop body
LE: loop exit
PB: predicated region body
PF: predicated region fallthrough
CT: control target
= control target key end

     0   :  { %s2782_s0 = inlined_call_operand.hbm [shape: bf16[2,8,32], index: 0, kind: input, shape index: {}]   ;;  %s2783_s1 = inlined_call_operand.vmem [shape: f32[2,1,1,8], index: 1, kind: input, shape index: {}]   ;;  %s2784_s2 = inlined_call_operand.hbm [shape: bf16[1,2,8,8], index: 2, kind: input, shape index: {}]   ;;  %s2785_s3 = inlined_call_operand.hbm [shape: f32[1,32], index: 3, kind: input, shape index: {}]   ;;  %s2786_s4 = inlined_call_operand.vmem [shape: bf16[32,32], index: 4, kind: input, shape index: {}]   ;;  %s2787_s5 = inlined_call_operand.vmem [shape: bf16[32,32], index: 5, kind: input, shape index: {}]   ;;  %s2788_s6 = inlined_call_operand.vmem [shape: bf16[32,32], index: 6, kind: input, shape index: {}]   ;;  %s2789_s7 = inlined_call_operand.hbm [shape: bf16[32,32], index: 7, kind: input, shape index: {}]   ;;  %s2790_s8 = inlined_call_operand.hbm [shape: f32[1,32], index: 8, kind: input, shape index: {}]   ;;  %s2791_s9 = inlined_call_operand.vmem [shape: bf16[32,64], index: 9, kind: input, shape index: {}]   ;;  %s2792_s10 = inlined_call_operand.vmem [shape: bf16[64,32], index: 10, kind: input, shape index: {}]   ;;  %s2793_s11 = inlined_call_operand.hbm [shape: bf16[2,8,32], index: 11, kind: output, shape index: {}]  }
   0x1   :  { %2800 = sst [smem:[#allocation16_spill]] %s2784_s2 }
   0x2   :  { %2801 = sst [smem:[#allocation17_spill]] %s2791_s9 }
   0x3   :  { %2802 = sst [smem:[#allocation18_spill]] %s2792_s10 }
   0x4   :  { %2803 = sst [smem:[#allocation19_spill]] %s2793_s11 }
   0x5   :  { %16 = vsyncpa [#allocation3], 0 }
   0x6   :  { %18 = vsyncpa [#allocation3 + $0x1], 0 }
   0x7   :  { %19 = vsyncpa [#allocation6], 0 }
   0x8   :  { %20 = vsyncpa [#allocation9], 0 }
   0x9   :  { %21 = vsyncpa [#allocation4], 0 }
   0xa   :  { %23 = vsyncpa [#allocation4 + $0x1], 0  ;;  %s2317_s17 = smov 0   ;;  %s2319_s18 = smov 0  }
   0xb   :  { %s2321_s19 = smov 0   ;;  %s2323_s20 = smov 0  }
   0xc LB: > { %s2243_s21 = smov [#allocation5]   ;;  %s2338_s23 = sadd.s32 4294967295, %s2241_s20   ;;  %s2241_s20 = sphi %s2323_s20, %s2828_s20   ;;  %s2237_s19 = sphi %s2321_s19, %s2827_s19   ;;  %s2233_s18 = sphi %s2319_s18, %s2826_s18   ;;  %s2229_s17 = sphi %s2317_s17, %s2825_s17  }
   0xd   : > { %s313_s22 = sshll.u32 %s2243_s21, 4  ;;  %p1740_p0 = scmp.ge.s32.totalorder %s2241_s20, 1  ;;  %s2343_s22 = int_to_ptr.vmem [resolvable:$true] %s313_s22 }
   0xe   : > { %p2797_p1 = scmp.eq.s32.totalorder %s2338_s23, 0  ;;  %p301_p2 = scmp.lt.s32.totalorder %s2241_s20, 3 }
   0xf   : > { %s2244_s25 = smov [#allocation8]   ;;  %s2245_s28 = smov [#allocation7]  }
  0x10   : > { %p2345_p3 = pnand %p1740_p0, %p301_p2  ;;  %s346_s26 = sshll.u32 %s2244_s25, 4  ;;  %s2358_s26 = int_to_ptr.vmem [resolvable:$true] %s346_s26 }
  0x11   : > { %s327_s29 = sshll.u32 %s2245_s28, 4  ;;  %s2806_s2 = sld [smem:[#allocation16_spill]]  ;;  %s2360_s29 = int_to_ptr.vmem [resolvable:$true] %s327_s29 }
  0x12   : > { %s2804_s24 = scalar_select %p2345_p3, 1, 0 }
  0x13   : > { %p1922_p5 = pneg %p2345_p3 }
  0x15   : > { %p2354_p6 = pnand %p1922_p5, %p2797_p1 }
  0x17   : > { %s2025_s13 = scalar_lea.hbm %s2806_s2, 128  ;;  %p2370_p8 = pneg %p2354_p6 }
  0x18   : > { %p2026_p7 = scmp.ne.s32.totalorder %s2806_s2, %s2025_s13  ;;  %p2032_p11 = scmp.lt.u32.totalorder %s2025_s13, %s2806_s2 }
  0x1a   : > { %p2028_p9 = pnand %p2370_p8, %p2026_p7 }
  0x1c   : > { %p2029_p10 = pneg %p2028_p9 }
  0x1e   : > { %p2034_p12 = pnand %p2032_p11, %p2029_p10 }
  0x20   : > { %2037 = shalt.err (!%p2034_p12)
}
  0x21   : > { %s2038_s28 = scalar_lea.vmem %s2343_s22, 128  ;;  %p2046_p5 = scmp.lt.s32.totalorder %s2343_s22, %s2343_s22 }
  0x22   : > { %p2039_p13 = scmp.ne.s32.totalorder %s2343_s22, %s2038_s28  ;;  %p2047_p4 = scmp.lt.s32.totalorder %s2038_s28, %s2038_s28 }
  0x24   : > { %p2041_p0 = pnand %p2039_p13, %p2370_p8  ;;  %p2048_p7 = por %p2047_p4, %p2046_p5 }
  0x26   : > { %p2042_p2 = pneg %p2041_p0 }
  0x28   : > { %p2049_p9 = pnand %p2048_p7, %p2042_p2 }
  0x2a   : > { %2052 = shalt.err (!%p2049_p9)
}
  0x2b   : > { %s2246_s30 = smov 64   ;;  %s2247_s12 = smov 4  }
  0x2c   : > { %1925 = dma.hbm_to_vmem [thread:$0]  (!%p2354_p6), %s2806_s2, 128, %s2343_s22, [#allocation6], %s2246_s30, %s2246_s30, %s2247_s12  }
  0x2d   : > { %s2053_s25 = scalar_lea.hbm %s2789_s7, 256 }
  0x2e   : > { %p2054_p4 = scmp.ne.s32.totalorder %s2789_s7, %s2053_s25  ;;  %p2060_p12 = scmp.lt.u32.totalorder %s2053_s25, %s2789_s7 }
  0x30   : > { %p2056_p10 = pnand %p2054_p4, %p2370_p8 }
  0x32   : > { %p2057_p11 = pneg %p2056_p10 }
  0x34   : > { %p2062_p13 = pnand %p2060_p12, %p2057_p11 }
  0x36   : > { %2065 = shalt.err (!%p2062_p13)
}
  0x37   : > { %s2066_s22 = scalar_lea.vmem %s2358_s26, 256  ;;  %p2074_p7 = scmp.lt.s32.totalorder %s2358_s26, %s2358_s26 }
  0x38   : > { %p2067_p0 = scmp.ne.s32.totalorder %s2358_s26, %s2066_s22  ;;  %p2075_p9 = scmp.lt.s32.totalorder %s2066_s22, %s2066_s22 }
  0x3a   : > { %p2069_p2 = pnand %p2067_p0, %p2370_p8  ;;  %p2076_p4 = por %p2075_p9, %p2074_p7 }
  0x3c   : > { %p2070_p5 = pneg %p2069_p2 }
  0x3e   : > { %p2077_p10 = pnand %p2076_p4, %p2070_p5 }
  0x40   : > { %2080 = shalt.err (!%p2077_p10)
}
  0x41   : > { %1931 = dma.hbm_to_vmem [thread:$0]  (!%p2354_p6), %s2789_s7, 256, %s2358_s26, [#allocation9], %s2246_s30, %s2246_s30, %s2247_s12  }
  0x42   : > { %s2081_s14 = scalar_lea.hbm %s2785_s3, 16 }
  0x43   : > { %p2082_p11 = scmp.ne.s32.totalorder %s2785_s3, %s2081_s14  ;;  %p2088_p0 = scmp.lt.u32.totalorder %s2081_s14, %s2785_s3 }
  0x45   : > { %p2084_p12 = pnand %p2082_p11, %p2370_p8 }
  0x47   : > { %p2085_p13 = pneg %p2084_p12 }
  0x49   : > { %p2090_p2 = pnand %p2088_p0, %p2085_p13 }
  0x4b   : > { %2093 = shalt.err (!%p2090_p2)
}
  0x4c   : > { %s2094_s26 = scalar_lea.vmem %s2360_s29, 16  ;;  %s2101_s30 = scalar_lea.vmem %s2360_s29, 32 }
  0x4d   : > { %p2095_p5 = scmp.ne.s32.totalorder %s2360_s29, %s2094_s26  ;;  %p2102_p4 = scmp.lt.s32.totalorder %s2360_s29, %s2360_s29 }
  0x4e   : > { %p2103_p10 = scmp.lt.s32.totalorder %s2101_s30, %s2094_s26 }
  0x4f   : > { %p2097_p7 = pnand %p2095_p5, %p2370_p8 }
  0x50   : > { %p2104_p11 = por %p2103_p10, %p2102_p4 }
  0x51   : > { %p2098_p9 = pneg %p2097_p7 }
  0x53   : > { %p2105_p12 = pnand %p2104_p11, %p2098_p9 }
  0x55   : > { %2108 = shalt.err (!%p2105_p12)
}
  0x56   : > { %1928 = dma.hbm_to_vmem [thread:$0]  (!%p2354_p6), %s2785_s3, 16, %s2360_s29, [#allocation6]  }
  0x57   : > { %s2248_s9 = smov [#allocation10]   ;;  %s2109_s14 = scalar_lea.hbm %s2790_s8, 16 }
  0x58   : > { %s360_s10 = sshll.u32 %s2248_s9, 4  ;;  %p2110_p13 = scmp.ne.s32.totalorder %s2790_s8, %s2109_s14  ;;  %s361_s10 = int_to_ptr.vmem [resolvable:$true] %s360_s10 }
  0x59   : > { %p2116_p5 = scmp.lt.u32.totalorder %s2109_s14, %s2790_s8 }
  0x5a   : > { %p2112_p0 = pnand %p2110_p13, %p2370_p8 }
  0x5c   : > { %p2113_p2 = pneg %p2112_p0 }
  0x5e   : > { %p2118_p7 = pnand %p2116_p5, %p2113_p2 }
  0x60   : > { %2121 = shalt.err (!%p2118_p7)
}
  0x61   : > { %s2122_s29 = scalar_lea.vmem %s361_s10, 16  ;;  %s2129_s26 = scalar_lea.vmem %s361_s10, 32 }
  0x62   : > { %p2123_p9 = scmp.ne.s32.totalorder %s361_s10, %s2122_s29  ;;  %p2130_p11 = scmp.lt.s32.totalorder %s361_s10, %s361_s10 }
  0x63   : > { %p2131_p12 = scmp.lt.s32.totalorder %s2129_s26, %s2122_s29 }
  0x64   : > { %p2125_p4 = pnand %p2123_p9, %p2370_p8 }
  0x65   : > { %p2132_p1 = por %p2131_p12, %p2130_p11 }
  0x66   : > { %p2126_p10 = pneg %p2125_p4 }
  0x68   : > { %p2133_p3 = pnand %p2132_p1, %p2126_p10 }
  0x6a   : > { %2136 = shalt.err (!%p2133_p3)
}
  0x6b   : > { %1934 = dma.hbm_to_vmem [thread:$0]  (!%p2354_p6), %s2790_s8, 16, %s361_s10, [#allocation9]  }
  0x6c   : > { %s1739_s16 = sadd.s32 4294967294, %s2241_s20   ;;  %s2458_s27 = sadd.s32 1, %s2241_s20  }
  0x6d   : > { %s33_s22 = ssub.s32 %s2241_s20, %s2458_s27  ;;  %s36_s9 = sadd.s32 1, %s2237_s19 }
  0x6e   : > { %p34_p1 = scmp.eq.s32.totalorder %s33_s22, 0  ;;  %p43_p3 = scmp.ne.s32.totalorder %s2237_s19, %s2233_s18 }
  0x6f   : > { %p44_p8 = scmp.eq.s32.totalorder %s2241_s20, 0  ;;  %p49_p13 = scmp.ne.s32.totalorder %s2233_s18, %s2229_s17 }
  0x70   : > { %s2469_s11 = scalar_select %p34_p1, %s2237_s19, %s36_s9  }
  0x71   : > { %p2471_p0 = por %p44_p8, %p43_p3  ;;  %p2809_p2 = scmp.eq.s32.totalorder %s2338_s23, 0 }
  0x72   : > { %p288_p5 = scmp.eq.s32.totalorder %s2338_s23, 1  ;;  %p294_p7 = scmp.eq.s32.totalorder %s1739_s16, 1 }
  0x73   : > { %p2477_p6 = por %p2809_p2, %p49_p13  ;;  %p1947_p9 = scmp.lt.s32.totalorder %s2241_s20, 2 }
  0x74   : > { %s377_s14 = sand.u32 1, %s2237_s19   ;;  %p2484_p4 = por %p288_p5, %p43_p3 }
  0x75   : > { %p2488_p10 = por %p294_p7, %p49_p13  ;;  %s1746_s25 = sshll.u32 %s377_s14, 2 }
  0x76   : > { %s2811_s15 = scalar_select %p2484_p4, 1, 0 }
  0x77   : > { %s2812_s21 = scalar_select %p2488_p10, 1, 0 }
  0x78   : > { %s1747_s28 = sshll.u32 %s2241_s20, 6  ;;  %s381_s12 = scalar_lea.vmem [#allocation2], %s1746_s25 }
  0x79   : > { %s2496_s30 = scalar_lea.hbm %s2782_s0, %s1747_s28  ;;  %s388_s16 = sshll.u32 %s381_s12, 4  ;;  %s2498_s16 = int_to_ptr.vmem [resolvable:$true] %s388_s16 }
  0x7a   : > { %p2502_p11 = pnand %p1947_p9, %p2471_p0  ;;  %s378_s9 = scalar_lea.sflag [#allocation3], %s377_s14 }
  0x7b   : > { %s2137_s2 = scalar_lea.hbm %s2496_s30, 64  ;;  %s2142_s29 = scalar_lea.hbm %s2782_s0, 128 }
  0x7c   : > { %p2138_p12 = scmp.ne.s32.totalorder %s2496_s30, %s2137_s2  ;;  %p2139_p1 = pneg %p2502_p11 }
  0x7d   : > { %p2143_p13 = scmp.lt.u32.totalorder %s2496_s30, %s2782_s0  ;;  %p2144_p0 = scmp.lt.u32.totalorder %s2142_s29, %s2137_s2 }
  0x7e   : > { %p2140_p3 = pnand %p2139_p1, %p2138_p12  ;;  %p2146_p5 = scmp.lt.u32.totalorder %s2137_s2, %s2496_s30 }
  0x7f   : > { %p2145_p2 = por %p2144_p0, %p2143_p13 }
  0x80   : > { %p2141_p8 = pneg %p2140_p3 }
  0x81   : > { %p2147_p7 = por %p2146_p5, %p2145_p2 }
  0x83   : > { %p2148_p9 = pnand %p2147_p7, %p2141_p8 }
  0x85   : > { %2151 = shalt.err (!%p2148_p9)
}
  0x86   : > { %s2152_s14 = scalar_lea.vmem %s2498_s16, 64  ;;  %s2249_s12 = smov [#allocation2]  }
  0x87   : > { %p2153_p12 = scmp.ne.s32.totalorder %s2498_s16, %s2152_s14  ;;  %s2157_s25 = sshll.u32 %s2249_s12, 4  ;;  %s2158_s25 = int_to_ptr.vmem [resolvable:$false] %s2157_s25 }
  0x88   : > { %s2159_s28 = scalar_lea.vmem %s2158_s25, 128  ;;  %p2160_p4 = scmp.lt.s32.totalorder %s2498_s16, %s2158_s25 }
  0x89   : > { %p2155_p3 = pnand %p2153_p12, %p2139_p1  ;;  %p2161_p13 = scmp.lt.s32.totalorder %s2159_s28, %s2152_s14 }
  0x8b   : > { %p2156_p10 = pneg %p2155_p3  ;;  %p2162_p0 = por %p2161_p13, %p2160_p4 }
  0x8d   : > { %p2163_p2 = pnand %p2162_p0, %p2156_p10 }
  0x8f   : > { %2166 = shalt.err (!%p2163_p2)
}
  0x90   : > { %1938 = dma.hbm_to_vmem [thread:$0]  (!%p2502_p11), %s2496_s30, 64, %s2498_s16, %s378_s9  }
  0x91   : > { %p2814_p8 = scmp.ne.s32.totalorder %s2804_s24, 0 }
  0x92   : > { %s2534_s2 = sand.u32 (!%p2814_p8), 1, %s2233_s18  }
  0x93   : > { %403 = sbr.rel (%p2814_p8) target bundleno = 2249 (0x8c9), region = 64  ;;  %s1749_s29 = sshll.u32 (!%p2814_p8), %s2534_s2, 2 }
  0x94   : > { %s406_s13 = scalar_lea.sflag (!%p2814_p8), [#allocation3], %s2534_s2  ;;  %s409_s26 = scalar_lea.vmem (!%p2814_p8), [#allocation2], %s1749_s29 }
  0x9a   : > { %2212 = dma.done.wait (%p2477_p6), %s406_s13, 64  }
  0x9b   : > { %2214 = vsyncadd (%p2477_p6), %s406_s13, 4294967232  ;;  %p2815_p4 = scmp.eq.s32.totalorder %s2338_s23, 0 }
  0x9d   : > { %2216 = dma.done.wait (%p2815_p4), [#allocation6], 144   ;;  %p2816_p10 = pmov %p2815_p4 }
  0x9e   : > { %p2817_p11 = pmov %p2815_p4 }
  0x9f   : > { %2218 = vsyncadd (%p2816_p10), [#allocation6], 4294967152 }
  0xa0   : > { %2220 = dma.done.wait (%p2817_p11), [#allocation9], 272   ;;  %p2818_p1 = pmov %p2815_p4 }
  0xa1   : > { %vm476_vm0 = vcmask 261120   ;;  %v473_v0 = vld [vmem:[%s409_s26] sm:$0xf]  ;;  %v2250_v10 = vmov 0.0   ;;  %v1999_v11 = vld [vmem:[%s2787_s5 + $0x8] sm:$0xff]   ;;  %vm2251_vm1 = vmmov 0   ;;  %v616_v44 = vlaneseq }
  0xa2   : > { %2222 = vsyncadd (%p2818_p1), [#allocation9], 4294967024  ;;  %v852_v1 = vld [vmem:[%s409_s26] sm:$0xf]  ;;  %v474_v2 = vunpack.c.l.bf16 %v473_v0  ;;  %1826 = vmatprep.subr.bf16.mxu0 %v2250_v10  ;;  %1834 = vmatprep.subr.bf16.mxu1 %v2250_v10  ;;  %v2000_v12 = vld [vmem:[%s2788_s6 + $0x8] sm:$0xff]   ;;  %s2252_s24 = smov 112  }
  0xa3   : > { %v2552_v3 = vunpack.c.l.bf16 %v852_v1  ;;  %v1997_v8 = vld [vmem:[%s2787_s5] sm:$0xff]   ;;  %1830 = vmatprep.mubr.msk.bf16.mxu0 %vm2251_vm1, %v2250_v10  ;;  %1838 = vmatprep.mubr.msk.bf16.mxu1 %vm2251_vm1, %v2250_v10  ;;  %v1755_v20 = vld [vmem:[#allocation7] ss:$0 sm:$0xff]  ;;  %v2002_v28 = vld [vmem:[%s2786_s4 + $0x8] sm:$0xff]   ;;  %v2253_v42 = vmov 1983009808  }
  0xa4   : > { %v475_v4 = vmul.f32 %v474_v2, %v474_v2  ;;  %v1998_v9 = vld [vmem:[%s2788_s6] sm:$0xff]   ;;  %1827 = vmatpush3.bf16.msra.mxu0 %v1997_v8  ;;  %v614_v43 = vunpack.c.l.s4 %v2253_v42  ;;  %v617_v46 = vshrl.u32 %v616_v44, 7  ;;  %v2254_v47 = vmov 1934713408   ;;  %p467_p6 = scmp.lt.s32.totalorder %s2338_s23, 1  ;;  %s2255_s9 = smov 16  }
  0xa5   : > { %v854_v5 = vmul.f32 %v2552_v3, %v2552_v3  ;;  %1835 = vmatpush3.bf16.msra.mxu1 %v1998_v9  ;;  %1828 = vmatprep.subr.bf16.mxu0 %v2250_v10  ;;  %v2001_v24 = vld [vmem:[%s2786_s4] sm:$0xff]   ;;  %v645_v48 = vunpack.c.l.s4 %v2254_v47  ;;  %vm1049_vm2 = vcmask 130048   ;;  %vm1151_vm3 = vcmask 64512   ;;  %s2819_s25 = sld [smem:[#allocation17_spill]]  ;;  %s1791_s28 = sshll.u32 %s2338_s23, 6 }
  0xa6   : > { %v477_v6 = vsel %vm476_vm0, %v475_v4, 0.0  ;;  %1836 = vmatprep.subr.bf16.mxu1 %v2250_v10  ;;  %v615_v45 = vunpack.c.0.s8 %v614_v43  ;;  %s468_s10 = scalar_select %p467_p6, %s2338_s23, 1  ;;  %vm1175_vm4 = vcmask 1043456   ;;  %vm1560_vm5 = vcmask 523264  }
  0xa7   : > { %v855_v7 = vsel %vm476_vm0, %v854_v5, 0.0  ;;  %478 = vadd.xlane.f32.xlu0 %v477_v6  ;;  %v646_v50 = vunpack.c.0.s8 %v645_v48  ;;  %s466_s13 = scalar_lea.vmem [#allocation11], %s1749_s29  ;;  %vm1606_vm6 = vcmask 257024   ;;  %s2821_s16 = sld [smem:[#allocation19_spill]] }
  0xa8   : > { %1829 = vmatpush3.bf16.msra.mxu0 %v1999_v11  ;;  %v2602_v49 = vsub.s32 %v615_v45, %v617_v46  ;;  %s469_s22 = scalar_lea.vmem %s2783_s1, %s468_s10  ;;  %s2820_s10 = sld [smem:[#allocation18_spill]] }
  0xa9   : > { %1837 = vmatpush3.bf16.msra.mxu1 %v2000_v12  ;;  %1842 = vmatprep.subr.bf16.mxu0 %v2250_v10  ;;  %v2606_v54 = vsub.s32 %v646_v50, %v617_v46  ;;  %s1622_s26 = sshll.u32 %s466_s13, 4  ;;  %s1609_s23 = scalar_lea.sflag [#allocation4], %s2534_s2  ;;  %s2740_s26 = int_to_ptr.vmem [resolvable:$true] %s1622_s26 }
  0xaa   : > { %1850 = vmatprep.subr.bf16.mxu1 %v2250_v10  ;;  %s2167_s29 = scalar_lea.vmem %s2740_s26, 64  ;;  %p2822_p7 = scmp.ne.s32.totalorder %s2811_s15, 0 }
  0xab   : > { %856 = vadd.xlane.f32.xlu0 %v855_v7  ;;  %p2168_p5 = scmp.ne.s32.totalorder %s2740_s26, %s2167_s29 }
  0xad   : > { %p2169_p9 = pnand %p2168_p5, %p2822_p7 }
  0xaf   : > { %p2170_p12 = pneg %p2169_p9 }
 0x134   : > { %v479_v13 = vpop.xlane.xlu0 %478 }
 0x135   : > { %v481_v14 = vmul.f32 0.03125, %v479_v13 }
 0x137   : > { %v482_v15 = vadd.f32 1e-06, %v481_v14 }
 0x138   : > { %v857_v16 = vpop.xlane.xlu0 %856 }
 0x139   : > { %2011 = vrsqrt.f32 %v482_v15  ;;  %v858_v17 = vmul.f32 0.03125, %v857_v16 }
 0x13b   : > { %v859_v18 = vadd.f32 1e-06, %v858_v17 }
 0x13d   : > { %2013 = vrsqrt.f32 %v859_v18 }
 0x143   : > { %v2012_v19 = vpop.eup %2011 }
 0x144   : > { %v484_v21 = vmul.f32 %v2012_v19, %v474_v2 }
 0x146   : > { %v491_v22 = vmul.f32 %v1755_v20, %v484_v21 }
 0x147   : > { %v2014_v23 = vpop.eup %2013 }
 0x148   : > { %v492_v25 = vpack.c.bf16 %v491_v22, %v491_v22  ;;  %v861_v26 = vmul.f32 %v2014_v23, %v2552_v3 }
 0x14a   : > { %1831 = vmatmul.mubr.msk.bf16.vlgmr.msra.gmra.mrb[0].mxu0 %vm476_vm0, %v492_v25  ;;  %v862_v27 = vmul.f32 %v1755_v20, %v861_v26  ;;  %1839 = vmatmul.mubr.msk.bf16.vlgmr.msra.gmra.mrb[0].mxu1 %vm476_vm0, %v492_v25 }
 0x14b   : > { %1843 = vmatpush3.bf16.msra.mxu0 %v2001_v24  ;;  %1846 = vmatprep.mubr.msk.bf16.mxu0 %vm2251_vm1, %v2250_v10 }
 0x14c   : > { %1844 = vmatprep.subr.bf16.mxu0 %v2250_v10  ;;  %1852 = vmatprep.mubr.msk.bf16.mxu1 %vm2251_vm1, %v2250_v10  ;;  %v863_v29 = vpack.c.bf16 %v862_v27, %v862_v27 }
 0x14f   : > { %1845 = vmatpush3.bf16.msra.mxu0 %v2002_v28 }
 0x150   : > { %1856 = vmatprep.subr.bf16.mxu0 %v2250_v10 }
 0x152   : > { %1847 = vmatmul.mubr.msk.bf16.vlgmr.msra.gmra.mrb[4].mxu0 %vm476_vm0, %v863_v29 }
 0x153   : > { %1858 = vmatprep.mubr.msk.bf16.mxu0 %vm2251_vm1, %v2250_v10 }
 0x21d   : > { %v546_v30 = vpop.f32.mrb[0].mxu0  ;;  %v2598_v31 = vpop.f32.mrb[0].mxu1 }
 0x21e   : > { %v1840_v32 = vpop.f32.mrb[1].mxu1  ;;  %609 = vrot.lane.b32.xlu1 %v546_v30, %s2252_s24  ;;  %v1832_v33 = vpop.f32.mrb[1].mxu0  ;;  %v612_v51 = vcombine.high %v546_v30, %v2250_v10  ;;  %v619_v53 = vrot.slane %v546_v30, %v2602_v49 }
 0x21f   : > { %v549_v34 = vpop.f32.mrb[2].mxu0  ;;  %v605_v35 = vpop.f32.mrb[2].mxu1 }
 0x220   : > { %v1833_v36 = vpop.f32.mrb[3].mxu0  ;;  %v1841_v37 = vpop.f32.mrb[3].mxu1  ;;  %v626_v57 = vrot.slane %v612_v51, %v2602_v49 }
 0x225   : > { %v917_v38 = vpop.f32.mrb[4].mxu0 }
 0x226   : > { %924 = vrot.lane.b32.xlu1 %v917_v38, %s2252_s24  ;;  %v1848_v39 = vpop.f32.mrb[5].mxu0  ;;  %v927_v6 = vcombine.high %v917_v38, %v2250_v10  ;;  %v934_v13 = vrot.slane %v917_v38, %v2602_v49 }
 0x227   : > { %v920_v40 = vpop.f32.mrb[6].mxu0 }
 0x228   : > { %v1849_v41 = vpop.f32.mrb[7].mxu0  ;;  %v941_v19 = vrot.slane %v927_v6, %v2602_v49 }
 0x290   : > { %v610_v52 = vpop.permute.xlu1 %609 }
 0x291   : > { %v627_v55 = vcombine.high %v610_v52, %v2250_v10  ;;  %v634_v56 = vrot.slane %v610_v52, %v2602_v49 }
 0x293   : > { %v641_v58 = vrot.slane %v627_v55, %v2602_v49  ;;  %v642_v59 = vcombine.low %v619_v53, %v634_v56  ;;  %v643_v60 = vcombine.high %v619_v53, %v634_v56 }
 0x295   : > { %v650_v61 = vrot.slane %v642_v59, %v2606_v54  ;;  %v657_v62 = vrot.slane %v643_v60, %v2606_v54  ;;  %v658_v63 = vcombine.low %v626_v57, %v641_v58  ;;  %v659_v0 = vcombine.high %v626_v57, %v641_v58  ;;  %v1795_v57 = vld [vmem:[#allocation5] sm:$0xff]  }
 0x296   : > { %v1796_v58 = vunpack.c.l.bf16 %v1795_v57  ;;  %v1797_v59 = vunpack.c.h.bf16 %v1795_v57 }
 0x297   : > { %v666_v1 = vrot.slane %v658_v63, %v2606_v54  ;;  %v673_v2 = vrot.slane %v659_v0, %v2606_v54  ;;  %v678_v4 = vcombine.low %v650_v61, %v657_v62  ;;  %v1762_v5 = vcombine.high %v650_v61, %v657_v62  ;;  %v1773_v62 = vld [vmem:[%s469_s22] ss:$0 sm:$0xff]  ;;  %s2738_s22 = scalar_lea.hbm %s2821_s16, %s1791_s28 }
 0x298   : > { %v925_v7 = vpop.permute.xlu1 %924 }
 0x299   : > { %v685_v8 = vrot.slane %v678_v4, %v2602_v49  ;;  %v693_v9 = vrot.slane %v1762_v5, %v2602_v49  ;;  %v694_v11 = vcombine.low %v666_v1, %v673_v2  ;;  %v1763_v12 = vcombine.high %v666_v1, %v673_v2 }
 0x29a   : > { %v942_v14 = vcombine.high %v925_v7, %v2250_v10  ;;  %v949_v15 = vrot.slane %v925_v7, %v2602_v49 }
 0x29b   : > { %v701_v16 = vrot.slane %v694_v11, %v2602_v49  ;;  %v709_v17 = vrot.slane %v1763_v12, %v2602_v49  ;;  %v710_v18 = vcombine.low %v685_v8, %v693_v9 }
 0x29c   : > { %v956_v20 = vrot.slane %v942_v14, %v2602_v49  ;;  %v957_v21 = vcombine.low %v934_v13, %v949_v15  ;;  %v958_v22 = vcombine.high %v934_v13, %v949_v15 }
 0x29d   : > { %v718_v23 = vcombine.low %v701_v16, %v709_v17  ;;  %v717_v28 = vrot.slane %v710_v18, %v2606_v54  ;;  %v734_v17 = vcombine.high %v2598_v31, %v2250_v10 }
 0x29e   : > { %v965_v24 = vrot.slane %v957_v21, %v2606_v54  ;;  %v972_v25 = vrot.slane %v958_v22, %v2606_v54  ;;  %v973_v26 = vcombine.low %v941_v19, %v956_v20  ;;  %v974_v27 = vcombine.high %v941_v19, %v956_v20 }
 0x29f   : > { %v725_v29 = vrot.slane %v718_v23, %v2606_v54  ;;  %v741_v21 = vrot.slane %v2598_v31, %v2602_v49 }
 0x2a0   : > { %v981_v30 = vrot.slane %v973_v26, %v2606_v54  ;;  %v988_v32 = vrot.slane %v974_v27, %v2606_v54  ;;  %v993_v33 = vcombine.low %v965_v24, %v972_v25  ;;  %v1769_v34 = vcombine.high %v965_v24, %v972_v25 }
 0x2a1   : > { %v726_v35 = vcombine.low %v717_v28, %v725_v29  ;;  %v727_v36 = vcombine.high %v717_v28, %v725_v29  ;;  %v748_v24 = vrot.slane %v734_v17, %v2602_v49 }
 0x2a2   : > { %v1000_v37 = vrot.slane %v993_v33, %v2602_v49  ;;  %v1008_v38 = vrot.slane %v1769_v34, %v2602_v49  ;;  %v1009_v39 = vcombine.low %v981_v30, %v988_v32  ;;  %v1770_v40 = vcombine.high %v981_v30, %v988_v32 }
 0x2a3   : > { %v728_v41 = vpack.c.bf16 %v726_v35, %v726_v35  ;;  %v729_v42 = vpack.c.bf16 %v727_v36, %v727_v36 }
 0x2a4   : > { %v1016_v43 = vrot.slane %v1009_v39, %v2602_v49  ;;  %v1024_v44 = vrot.slane %v1770_v40, %v2602_v49  ;;  %v1025_v45 = vcombine.low %v1000_v37, %v1008_v38 }
 0x2a5   : > { %v1054_v46 = vsel %vm1049_vm2, %v728_v41, 0  ;;  %v1100_v47 = vsel %vm1049_vm2, %v729_v42, 0 }
 0x2a6   : > { %v1033_v48 = vcombine.low %v1016_v43, %v1024_v44  ;;  %1851 = vmatpush3.bf16.xpose.msra.mxu1 %v1054_v46  ;;  %1857 = vmatpush3.bf16.xpose.msra.mxu0 %v1100_v47  ;;  %v1032_v50 = vrot.slane %v1025_v45, %v2606_v54 }
 0x2a7   : > { %1862 = vmatprep.subr.bf16.mxu1 %v2250_v10  ;;  %1868 = vmatprep.subr.bf16.mxu0 %v2250_v10 }
 0x2a8   : > { %v1040_v51 = vrot.slane %v1033_v48, %v2606_v54 }
 0x2aa   : > { %v1041_v52 = vcombine.low %v1032_v50, %v1040_v51  ;;  %v1042_v53 = vcombine.high %v1032_v50, %v1040_v51 }
 0x2ac   : > { %v1043_v55 = vpack.c.bf16 %v1041_v52, %v1041_v52  ;;  %v1044_v56 = vpack.c.bf16 %v1042_v53, %v1042_v53 }
 0x2ae   : > { %1853 = vmatmul.mubr.msk.bf16.vlgmr.msra.gmra.mrb[4].mxu1 %vm1049_vm2, %v1043_v55  ;;  %1859 = vmatmul.mubr.msk.bf16.vlgmr.msra.gmra.mrb[8].mxu0 %vm1049_vm2, %v1044_v56 }
 0x2af   : > { %1864 = vmatprep.mubr.msk.bf16.mxu1 %vm2251_vm1, %v2250_v10  ;;  %1870 = vmatprep.mubr.msk.bf16.mxu0 %vm2251_vm1, %v2250_v10 }
 0x381   : > { %v1090_v60 = vpop.f32.mrb[4].mxu1  ;;  %v1136_v61 = vpop.f32.mrb[8].mxu0 }
 0x382   : > { %v1091_v63 = vadd.f32 %v1796_v58, %v1090_v60  ;;  %v1137_v0 = vadd.f32 %v1797_v59, %v1136_v61  ;;  %v1854_v1 = vpop.f32.mrb[5].mxu1  ;;  %v1860_v2 = vpop.f32.mrb[9].mxu0  ;;  %v2003_v60 = vld [vmem:[#allocation8] sm:$0xff]  }
 0x383   : > { %v1093_v4 = vpop.f32.mrb[6].mxu1  ;;  %v1139_v5 = vpop.f32.mrb[10].mxu0 }
 0x384   : > { %v1855_v6 = vpop.f32.mrb[7].mxu1  ;;  %v1861_v7 = vpop.f32.mrb[11].mxu0  ;;  %v1149_v8 = vadd.f32 %v1773_v62, %v1091_v63  ;;  %v1150_v9 = vadd.f32 %v1773_v62, %v1137_v0 }
 0x386   : > { %v1152_v11 = vsel %vm1151_vm3, %v1149_v8, -inf  ;;  %v1155_v12 = vsel %vm1151_vm3, %v1150_v9, -inf }
 0x387   : > { %1153 = vmax.xlane.f32.xlu0 %v1152_v11  ;;  %1156 = vmax.xlane.f32.xlu1 %v1155_v12 }
 0x39d   : > { %731 = vrot.lane.b32.xlu0 %v2598_v31, %s2252_s24 }
 0x414   : > { %v1154_v13 = vpop.xlane.xlu0 %1153  ;;  %v1157_v14 = vpop.xlane.xlu1 %1156 }
 0x415   : > { %v1158_v15 = vsub.f32 %v1149_v8, %v1154_v13  ;;  %v1159_v16 = vsub.f32 %v1150_v9, %v1157_v14 }
 0x417   : > { %v1160_v18 = vmul.f32 1.442695, %v1158_v15  ;;  %v1162_v19 = vmul.f32 1.442695, %v1159_v16 }
 0x418   : > { %v732_v20 = vpop.permute.xlu0 %731 }
 0x419   : > { %2015 = vpow2.f32 %v1160_v18  ;;  %v749_v22 = vcombine.high %v732_v20, %v2250_v10  ;;  %v756_v23 = vrot.slane %v732_v20, %v2602_v49 }
 0x41a   : > { %2017 = vpow2.f32 %v1162_v19 }
 0x41b   : > { %v763_v25 = vrot.slane %v749_v22, %v2602_v49  ;;  %v764_v26 = vcombine.low %v741_v21, %v756_v23  ;;  %v765_v27 = vcombine.high %v741_v21, %v756_v23 }
 0x41d   : > { %v772_v28 = vrot.slane %v764_v26, %v2606_v54  ;;  %v779_v29 = vrot.slane %v765_v27, %v2606_v54  ;;  %v780_v30 = vcombine.low %v748_v24, %v763_v25  ;;  %v781_v32 = vcombine.high %v748_v24, %v763_v25  ;;  %v2004_v25 = vld [vmem:[#allocation8 + $0x8] sm:$0xff]  }
 0x41f   : > { %v788_v31 = vrot.slane %v780_v30, %v2606_v54  ;;  %v795_v33 = vrot.slane %v781_v32, %v2606_v54  ;;  %v800_v34 = vcombine.low %v772_v28, %v779_v29  ;;  %v1764_v35 = vcombine.high %v772_v28, %v779_v29 }
 0x421   : > { %v807_v36 = vrot.slane %v800_v34, %v2602_v49  ;;  %v815_v37 = vrot.slane %v1764_v35, %v2602_v49  ;;  %v816_v38 = vcombine.low %v788_v31, %v795_v33  ;;  %v1765_v39 = vcombine.high %v788_v31, %v795_v33 }
 0x423   : > { %v2016_v40 = vpop.eup %2015  ;;  %v823_v41 = vrot.slane %v816_v38, %v2602_v49  ;;  %v831_v42 = vrot.slane %v1765_v39, %v2602_v49  ;;  %v832_v43 = vcombine.low %v807_v36, %v815_v37 }
 0x424   : > { %v2018_v44 = vpop.eup %2017  ;;  %v1164_v45 = vsel %vm1151_vm3, %v2016_v40, 0.0  ;;  %v1170_v58 = vpack.c.bf16 %v2016_v40, %v2016_v40 }
 0x425   : > { %1165 = vadd.xlane.f32.xlu0 %v1164_v45  ;;  %v1167_v46 = vsel %vm1151_vm3, %v2018_v44, 0.0  ;;  %v840_v47 = vcombine.low %v823_v41, %v831_v42  ;;  %v839_v48 = vrot.slane %v832_v43, %v2606_v54  ;;  %v1171_v59 = vpack.c.bf16 %v2018_v44, %v2018_v44 }
 0x426   : > { %1168 = vadd.xlane.f32.xlu1 %v1167_v46 }
 0x427   : > { %v847_v50 = vrot.slane %v840_v47, %v2606_v54 }
 0x429   : > { %v848_v51 = vcombine.low %v839_v48, %v847_v50  ;;  %v849_v52 = vcombine.high %v839_v48, %v847_v50 }
 0x42b   : > { %v850_v53 = vpack.c.bf16 %v848_v51, %v848_v51  ;;  %v851_v55 = vpack.c.bf16 %v849_v52, %v849_v52  ;;  %v2005_v51 = vld [vmem:[%s2819_s25] sm:$0xff]   ;;  %v2006_v52 = vld [vmem:[%s2819_s25 + $0x8] sm:$0xff]  }
 0x42d   : > { %v1177_v56 = vsel %vm1175_vm4, %v850_v53, 0  ;;  %v1223_v57 = vsel %vm1175_vm4, %v851_v55, 0  ;;  %v2008_v53 = vld [vmem:[%s2820_s10 + $0x8] sm:$0xff]   ;;  %v2009_v55 = vld [vmem:[%s2820_s10 + $0x10] sm:$0xff]  }
 0x42e   : > { %1863 = vmatpush3.bf16.msra.mxu1 %v1177_v56  ;;  %1869 = vmatpush3.bf16.msra.mxu0 %v1223_v57 }
 0x42f   : > { %1874 = vmatprep.subr.bf16.mxu1 %v2250_v10  ;;  %1882 = vmatprep.subr.bf16.mxu0 %v2250_v10 }
 0x431   : > { %1865 = vmatmul.mubr.msk.bf16.vlgmr.msra.gmra.mrb[8].mxu1 %vm1151_vm3, %v1170_v58  ;;  %1871 = vmatmul.mubr.msk.bf16.vlgmr.msra.gmra.mrb[12].mxu0 %vm1151_vm3, %v1171_v59 }
 0x432   : > { %1878 = vmatprep.mubr.msk.bf16.mxu1 %vm2251_vm1, %v2250_v10  ;;  %1886 = vmatprep.mubr.msk.bf16.mxu0 %vm2251_vm1, %v2250_v10 }
 0x433   : > { %1875 = vmatpush3.bf16.msra.mxu1 %v2003_v60  ;;  %1883 = vmatpush3.bf16.msra.mxu0 %v2005_v51  ;;  %v1781_v60 = vld [vmem:[#allocation10] ss:$0 sm:$0xff] }
 0x434   : > { %1876 = vmatprep.subr.bf16.mxu1 %v2250_v10  ;;  %1884 = vmatprep.subr.bf16.mxu0 %v2250_v10 }
 0x437   : > { %1877 = vmatpush3.bf16.msra.mxu1 %v2004_v25  ;;  %1885 = vmatpush3.bf16.msra.mxu0 %v2006_v52 }
 0x438   : > { %1890 = vmatprep.subr.bf16.mxu1 %v2250_v10 }
 0x4b2   : > { %v1166_v61 = vpop.xlane.xlu0 %1165 }
 0x4b3   : > { %v1169_v62 = vpop.xlane.xlu1 %1168  ;;  %2019 = vrcp.f32 %v1166_v61 }
 0x4b4   : > { %2021 = vrcp.f32 %v1169_v62 }
 0x4bd   : > { %v2020_v63 = vpop.eup %2019 }
 0x4be   : > { %v2022_v0 = vpop.eup %2021 }
 0x504   : > { %v1213_v1 = vpop.f32.mrb[8].mxu1  ;;  %v1259_v2 = vpop.f32.mrb[12].mxu0 }
 0x505   : > { %v1267_v4 = vmul.f32 %v2020_v63, %v1213_v1  ;;  %v1268_v5 = vmul.f32 %v2022_v0, %v1259_v2  ;;  %v1866_v6 = vpop.f32.mrb[9].mxu1  ;;  %v1872_v7 = vpop.f32.mrb[13].mxu0  ;;  %v2010_v0 = vld [vmem:[%s2820_s10 + $0x18] sm:$0xff]  }
 0x506   : > { %v1216_v8 = vpop.f32.mrb[10].mxu1  ;;  %v1262_v9 = vpop.f32.mrb[14].mxu0 }
 0x507   : > { %v1269_v11 = vcombine.high %v1267_v4, %v2250_v10  ;;  %v1276_v12 = vrot.slane %v1267_v4, %v2602_v49  ;;  %v1284_v13 = vcombine.high %v1268_v5, %v2250_v10  ;;  %v1291_v14 = vrot.slane %v1268_v5, %v2602_v49  ;;  %v1867_v15 = vpop.f32.mrb[11].mxu1  ;;  %v1873_v16 = vpop.f32.mrb[15].mxu0 }
 0x509   : > { %v1283_v17 = vrot.slane %v1269_v11, %v2602_v49  ;;  %v1298_v18 = vrot.slane %v1284_v13, %v2602_v49  ;;  %v1299_v19 = vcombine.low %v1276_v12, %v1291_v14  ;;  %v1300_v20 = vcombine.high %v1276_v12, %v1291_v14 }
 0x50b   : > { %v1307_v21 = vrot.slane %v1299_v19, %v2606_v54  ;;  %v1314_v22 = vrot.slane %v1300_v20, %v2606_v54  ;;  %v1315_v23 = vcombine.low %v1283_v17, %v1298_v18  ;;  %v1316_v24 = vcombine.high %v1283_v17, %v1298_v18 }
 0x50d   : > { %v1323_v26 = vrot.slane %v1315_v23, %v2606_v54  ;;  %v1330_v27 = vrot.slane %v1316_v24, %v2606_v54  ;;  %v1335_v28 = vcombine.low %v1307_v21, %v1314_v22  ;;  %v1776_v29 = vcombine.high %v1307_v21, %v1314_v22 }
 0x50f   : > { %v1351_v30 = vcombine.low %v1323_v26, %v1330_v27  ;;  %v1777_v32 = vcombine.high %v1323_v26, %v1330_v27  ;;  %v1342_v31 = vrot.slane %v1335_v28, %v2602_v49  ;;  %v1350_v33 = vrot.slane %v1776_v29, %v2602_v49 }
 0x511   : > { %v1358_v34 = vrot.slane %v1351_v30, %v2602_v49  ;;  %v1366_v35 = vrot.slane %v1777_v32, %v2602_v49  ;;  %v1367_v36 = vcombine.low %v1342_v31, %v1350_v33 }
 0x513   : > { %v1375_v37 = vcombine.low %v1358_v34, %v1366_v35  ;;  %v1374_v38 = vrot.slane %v1367_v36, %v2606_v54 }
 0x515   : > { %v1382_v39 = vrot.slane %v1375_v37, %v2606_v54 }
 0x517   : > { %v1384_v40 = vcombine.high %v1374_v38, %v1382_v39  ;;  %v1383_v41 = vcombine.low %v1374_v38, %v1382_v39 }
 0x519   : > { %1386 = vrot.lane.b32.xlu1 %v1384_v40, %s2255_s9  ;;  %s2256_s9 = smov [#allocation11]  }
 0x51a   : > { %s2171_s14 = sshll.u32 %s2256_s9, 4  ;;  %s2172_s14 = int_to_ptr.vmem [resolvable:$false] %s2171_s14 }
 0x51b   : > { %s2173_s12 = scalar_lea.vmem %s2172_s14, 128  ;;  %p2174_p3 = scmp.lt.s32.totalorder %s2740_s26, %s2172_s14 }
 0x51c   : > { %p2175_p13 = scmp.lt.s32.totalorder %s2173_s12, %s2167_s29 }
 0x51e   : > { %p2176_p0 = por %p2175_p13, %p2174_p3 }
 0x520   : > { %p2177_p2 = pnand %p2176_p0, %p2170_p12 }
 0x58b   : > { %v1387_v42 = vpop.permute.xlu1 %1386 }
 0x58c   : > { %v1389_v43 = vsel %vm1049_vm2, %v1383_v41, %v1387_v42 }
 0x58d   : > { %v1390_v44 = vpack.c.bf16 %v1389_v43, %v1389_v43 }
 0x58f   : > { %1879 = vmatmul.mubr.msk.bf16.vlgmr.msra.gmra.mrb[12].mxu1 %vm476_vm0, %v1390_v44 }
 0x590   : > { %1898 = vmatprep.mubr.msk.bf16.mxu1 %vm2251_vm1, %v2250_v10 }
 0x662   : > { %v1444_v49 = vpop.f32.mrb[12].mxu1 }
 0x663   : > { %v1450_v45 = vadd.f32 %v1444_v49, %v2552_v3  ;;  %v1880_v46 = vpop.f32.mrb[13].mxu1  ;;  %v2007_v3 = vld [vmem:[%s2820_s10] sm:$0xff]  }
 0x664   : > { %v1447_v47 = vpop.f32.mrb[14].mxu1  ;;  %1891 = vmatpush3.bf16.msra.mxu1 %v2007_v3 }
 0x665   : > { %v1881_v48 = vpop.f32.mrb[15].mxu1  ;;  %v1451_v54 = vmul.f32 %v1450_v45, %v1450_v45  ;;  %1892 = vmatprep.subr.bf16.mxu1 %v2250_v10 }
 0x667   : > { %v1452_v50 = vsel %vm476_vm0, %v1451_v54, 0.0 }
 0x668   : > { %1453 = vadd.xlane.f32.xlu0 %v1452_v50  ;;  %1893 = vmatpush3.bf16.msra.mxu1 %v2008_v53 }
 0x669   : > { %1894 = vmatprep.subr.bf16.mxu1 %v2250_v10 }
 0x66c   : > { %1895 = vmatpush3.bf16.msra.mxu1 %v2009_v55 }
 0x66d   : > { %1896 = vmatprep.subr.bf16.mxu1 %v2250_v10 }
 0x670   : > { %1897 = vmatpush3.bf16.msra.mxu1 %v2010_v0 }
 0x6f5   : > { %v1454_v56 = vpop.xlane.xlu0 %1453 }
 0x6f6   : > { %v1455_v57 = vmul.f32 0.03125, %v1454_v56 }
 0x6f8   : > { %v1456_v58 = vadd.f32 1e-06, %v1455_v57 }
 0x6fa   : > { %2023 = vrsqrt.f32 %v1456_v58 }
 0x704   : > { %v2024_v59 = vpop.eup %2023 }
 0x705   : > { %v1458_v61 = vmul.f32 %v2024_v59, %v1450_v45 }
 0x707   : > { %v1465_v62 = vmul.f32 %v1781_v60, %v1458_v61 }
 0x709   : > { %v1466_v63 = vpack.c.bf16 %v1465_v62, %v1465_v62 }
 0x70b   : > { %1887 = vmatmul.mubr.msk.bf16.vlgmr.msra.gmra.mrb[16].mxu0 %vm476_vm0, %v1466_v63 }
 0x7de   : > { %v1520_v1 = vpop.f32.mrb[16].mxu0 }
 0x7df   : > { %v1526_v10 = vmax.f32 %v1520_v1, 0.0  ;;  %v1888_v2 = vpop.f32.mrb[17].mxu0 }
 0x7e0   : > { %v1523_v4 = vpop.f32.mrb[18].mxu0 }
 0x7e1   : > { %v1527_v5 = vpack.c.bf16 %v1526_v10, %v1526_v10  ;;  %v1889_v6 = vpop.f32.mrb[19].mxu0 }
 0x7e3   : > { %1899 = vmatmul.mubr.msk.bf16.vlgmr.msra.gmra.mrb[16].mxu1 %vm1560_vm5, %v1527_v5 }
 0x8b6   : > { %v1598_v7 = vpop.f32.mrb[16].mxu1 }
 0x8b7   : > { %v1604_v8 = vadd.f32 %v1598_v7, %v1450_v45  ;;  %v1900_v9 = vpop.f32.mrb[17].mxu1 }
 0x8b8   : > { %v1601_v11 = vpop.f32.mrb[18].mxu1 }
 0x8b9   : > { %v1605_v12 = vpack.c.bf16 %v1604_v8, %v1604_v8  ;;  %v1901_v13 = vpop.f32.mrb[19].mxu1 }
 0x8bb   : > { %1607 = vst.msk [vmem:[%s466_s13] sm:$0xf] %vm1606_vm6, %v1605_v12 }
 0x8bc   : > { %2180 = shalt.err (!%p2177_p2)
}
 0x8bd   : > { %s2181_s2 = scalar_lea.hbm %s2738_s22, 64  ;;  %s2185_s24 = scalar_lea.hbm %s2821_s16, 128 }
 0x8be   : > { %p2182_p8 = scmp.ne.s32.totalorder %s2738_s22, %s2181_s2  ;;  %p2186_p11 = scmp.lt.u32.totalorder %s2738_s22, %s2821_s16 }
 0x8bf   : > { %p2187_p1 = scmp.lt.u32.totalorder %s2185_s24, %s2181_s2  ;;  %p2189_p5 = scmp.lt.u32.totalorder %s2181_s2, %s2738_s22 }
 0x8c0   : > { %p2183_p4 = pnand %p2182_p8, %p2822_p7 }
 0x8c1   : > { %p2188_p6 = por %p2187_p1, %p2186_p11 }
 0x8c2   : > { %p2184_p10 = pneg %p2183_p4 }
 0x8c3   : > { %p2190_p9 = por %p2189_p5, %p2188_p6 }
 0x8c5   : > { %p2191_p12 = pnand %p2190_p9, %p2184_p10 }
 0x8c7   : > { %2194 = shalt.err (!%p2191_p12)
}
 0x8c8   : > { %1920 = dma.vmem_to_hbm [thread:$0]  (%p2822_p7), %s2740_s26, 64, %s2738_s22, %s1609_s23  }
 0x8c9 PF: > { %s1634_s29 = sand.u32 1, %s2229_s17   ;;  %p2823_p3 = scmp.ne.s32.totalorder %s2812_s21, 0 }
 0x8ca   : > { %p2824_p13 = scmp.ge.s32.totalorder %s2241_s20, 2  ;;  %s1635_s14 = scalar_lea.sflag [#allocation4], %s1634_s29 }
 0x8cc   : > { %p1940_p0 = pnand %p2824_p13, %p2823_p3 }
 0x8ce   : > { %2224 = dma.done.wait (!%p1940_p0), %s1635_s14, 64  }
 0x8cf   : > { %2226 = vsyncadd (!%p1940_p0), %s1635_s14, 4294967232  ;;  %p26_p2 = scmp.ge.s32.totalorder %s2458_s27, 4   ;;  %s2825_s17 = smov %s2233_s18 }
 0x8d0   : > { %s2826_s18 = smov %s2237_s19  ;;  %s2827_s19 = smov %s2469_s11 }
 0x8d1   : > { %s2828_s20 = smov %s2458_s27  ;;  %28 = sbr.rel (!%p26_p2) target bundleno = 12 (0xc), region = 128 }
 0x8d8   :  { %1640 = vsyncpa [#allocation3], 1 }
 0x8d9   :  { %1642 = vsyncpa [#allocation3 + $0x1], 1 }
 0x8da   :  { %1643 = vsyncpa [#allocation6], 1 }
 0x8db   :  { %1644 = vsyncpa [#allocation9], 1 }
 0x8dc   :  { %1645 = vsyncpa [#allocation4], 1 }
 0x8dd   :  { %1647 = vsyncpa [#allocation4 + $0x1], 1 }

</bundles_post_ra>
